<compile_context>
chip_gen: v7x
topology: tpu7x:2x2x1
jax: 0.10.0
libtpu: 0.0.40
codegen_flags: <defaults>
</compile_context>

<pallas_src>
import functools

import jax
import jax.numpy as jnp
import numpy as np
from jax import lax
from jax.experimental import pallas as pl
from jax.experimental.pallas import tpu as pltpu


def _round_up(x, m):
    return (x + m - 1) // m * m


def _temporal_block_kernel(x_ref, mask_ref, w1_ref, b1_ref, w2_ref, b2_ref,
                           *rest, taps, OFF0, SHIFT, LQV, C_out,
                           identity_residual):
    """One batch element per grid step (channel-major, flattened space).

    x_ref   : (C_in_p, LIN)  bf16  flattened top/left zero-padded input image
                                   (row-major over padded width), zero tail.
    mask_ref: (1, LQV)       f32   1.0 at valid output lanes (kills row-wrap
                                   columns and the rounded-up tail).
    w1_ref  : (C_out, K*K*C_in_p) bf16  conv1 weights, im2col layout.
    w2_ref  : (C_out, K*K*C_out)  bf16  conv2 weights, im2col layout.
    wd_ref  : (C_out, C_in_p)     bf16  1x1 downsample (absent if identity).
    b*_ref  : (C_out, 1)     f32
    out_ref : (C_out, LQV)   f32   flat (h*Wpad + w) output; wrap cols = junk,
                                   dropped by the wrapper.
    h1_ref  : (C_out, LIN)   bf16  VMEM scratch: causally padded conv2 input.
    """
    if identity_residual:
        out_ref, h1_ref = rest
        wd_ref = bd_ref = None
    else:
        wd_ref, bd_ref, out_ref, h1_ref = rest

    DELTA = SHIFT - OFF0

    # ---- conv1: im2col straight from the bf16 input ref, ONE MXU matmul ----
    a1 = jnp.concatenate([x_ref[:, t:t + LQV] for t in taps], axis=0)
    h1 = jnp.dot(w1_ref[...], a1, preferred_element_type=jnp.float32)
    h1 = jnp.maximum(h1 + b1_ref[...], 0.0)              # relu1
    # TODO(synk): nn.Dropout2d is stochastic channel dropout; eval-mode
    # (identity) semantics are implemented here.

    # Stage the masked activation in VMEM: the aligned zero prefix is the
    # causal top/left pad, the mask zeroes the row-wrap columns and the tail,
    # so the scratch IS the causally zero-padded conv2 input (flattened).
    h1_ref[:, :SHIFT] = jnp.zeros((C_out, SHIFT), jnp.bfloat16)
    h1_ref[:, SHIFT:SHIFT + LQV] = (h1 * mask_ref[...]).astype(jnp.bfloat16)

    # ---- conv2: im2col from the scratch ref, ONE MXU matmul ----------------
    a2 = jnp.concatenate(
        [h1_ref[:, t + DELTA:t + DELTA + LQV] for t in taps], axis=0)
    h2 = jnp.dot(w2_ref[...], a2, preferred_element_type=jnp.float32)
    h2 = jnp.maximum(h2 + b2_ref[...], 0.0)              # relu2

    # ---- residual (1x1 downsample, or identity) + final relu ---------------
    x_res = x_ref[:, OFF0:OFF0 + LQV]                    # x at output positions
    if identity_residual:
        # x travels in bf16 (to halve the DMA) -> bf16-rounded identity; pass a
        # separate f32 residual input if exact identity matching is required.
        res = x_res[:C_out, :].astype(jnp.float32)
    else:
        res = jnp.dot(wd_ref[...], x_res,
                      preferred_element_type=jnp.float32) + bd_ref[...]
    out_ref[...] = jnp.maximum(h2 + res, 0.0)


def _const_spec(shape):
    """BlockSpec for a grid-constant operand: single pipeline buffer (it is
    never re-fetched), falling back to the default if the installed JAX does
    not expose pipeline_mode."""
    try:
        return pl.BlockSpec(shape, lambda n: (0, 0),
                            pipeline_mode=pl.Buffered(1))
    except (AttributeError, TypeError):
        return pl.BlockSpec(shape, lambda n: (0, 0))


def temporal_block_2d(x_nchw, params, *, kernel_size, stride, dilation, padding):
    """Forward pass of TemporalBlock2D. x_nchw: (N, C_in, H, W) float32."""
    assert stride == 1, "TCN block is implemented for stride=1"
    assert padding == dilation * (kernel_size - 1), \
        "causal TCN requires padding == dilation*(kernel_size-1)"

    w1, b1, w2, b2, wd, bd = params
    N, C_in, H, W = x_nchw.shape
    C_out = w1.shape[0]
    K, D, P = kernel_size, dilation, padding

    Hpad, Wpad = H + P, W + P
    LQ = H * Wpad                        # flat length of the (h, padded-w) grid
    LQV = _round_up(LQ, 128)             # lane-dense output width
    OFF0 = P * Wpad + P                  # causal (top/left) pad length, flat
    SHIFT = _round_up(OFF0, 128)         # aligned causal-pad prefix in scratch
    LIN = SHIFT + LQV                    # flat length of input / scratch
    C_in_p = _round_up(C_in, 8)          # sublane-friendly channel count

    # channel-major causal (top/left) zero pad in bf16, flatten row-major over
    # the padded width, lane-pad the tail (single padded copy; for production
    # pipelines fold this into the producer / allow_input_fusion).
    xpad = jnp.pad(x_nchw.astype(jnp.bfloat16),
                   ((0, 0), (0, C_in_p - C_in), (P, 0), (P, 0)))
    xf = xpad.reshape(N, C_in_p, Hpad * Wpad)
    xf = jnp.pad(xf, ((0, 0), (0, 0), (0, LIN - Hpad * Wpad)))

    # conv-tap lane offsets in the flattened padded image (kh outer, kw inner).
    taps = tuple(kh * D * Wpad + kw * D for kh in range(K) for kw in range(K))

    # validity mask over conv1 output lanes (precomputed, no in-kernel iota).
    q = np.arange(LQV)
    valid = (q < LQ) & ((q % Wpad) < W)
    mask_k = jnp.asarray(valid.astype(np.float32)).reshape(1, LQV)

    # PyTorch OIHW -> im2col (tap-major, channel-minor) layouts, bf16 for MXU.
    w1_t = jnp.pad(jnp.transpose(w1, (0, 2, 3, 1)),
                   ((0, 0), (0, 0), (0, 0), (0, C_in_p - C_in)))
    w1_k = w1_t.reshape(C_out, K * K * C_in_p).astype(jnp.bfloat16)
    w2_k = jnp.transpose(w2, (0, 2, 3, 1)).reshape(
        C_out, K * K * C_out).astype(jnp.bfloat16)
    b1_k = b1.reshape(C_out, 1).astype(jnp.float32)
    b2_k = b2.reshape(C_out, 1).astype(jnp.float32)

    identity_residual = wd is None
    inputs = [xf, mask_k, w1_k, b1_k, w2_k, b2_k]
    in_specs = [
        pl.BlockSpec((None, C_in_p, LIN), lambda n: (n, 0, 0)),
        _const_spec(mask_k.shape),
        _const_spec(w1_k.shape),
        _const_spec(b1_k.shape),
        _const_spec(w2_k.shape),
        _const_spec(b2_k.shape),
    ]
    if identity_residual:
        assert C_in == C_out, "identity residual requires n_inputs == n_outputs"
    else:
        wd_k = jnp.pad(wd[:, :, 0, 0],
                       ((0, 0), (0, C_in_p - C_in))).astype(jnp.bfloat16)
        bd_k = bd.reshape(C_out, 1).astype(jnp.float32)
        inputs += [wd_k, bd_k]
        in_specs += [_const_spec(wd_k.shape), _const_spec(bd_k.shape)]

    kernel = functools.partial(
        _temporal_block_kernel, taps=taps, OFF0=OFF0, SHIFT=SHIFT, LQV=LQV,
        C_out=C_out, identity_residual=identity_residual)

    out = pl.pallas_call(
        kernel,
        out_shape=jax.ShapeDtypeStruct((N, C_out, LQV), jnp.float32),
        grid_spec=pltpu.PrefetchScalarGridSpec(
            num_scalar_prefetch=0,
            grid=(N,),
            in_specs=in_specs,
            out_specs=pl.BlockSpec((None, C_out, LQV), lambda n: (n, 0, 0)),
            scratch_shapes=[pltpu.VMEM((C_out, LIN), jnp.bfloat16)],
        ),
        compiler_params=pltpu.CompilerParams(
            dimension_semantics=("parallel",)),   # megacore over the batch
    )(*inputs)

    # (N, C_out, h*Wpad + w) -> NCHW: drop row-wrap columns.  No transpose.
    return out[:, :, :LQ].reshape(N, C_out, H, Wpad)[:, :, :, :W]


def reference(x, params, *, kernel_size, stride, dilation, padding):
    """Pure-JAX (f32) reference mirroring the PyTorch module in eval mode."""
    w1, b1, w2, b2, wd, bd = params

    def conv(inp, w, b, pad, dil):
        y = lax.conv_general_dilated(
            inp, w, window_strides=(stride, stride),
            padding=[(pad, pad), (pad, pad)],
            rhs_dilation=(dil, dil),
            dimension_numbers=('NCHW', 'OIHW', 'NCHW'))
        return y + b[None, :, None, None]

    out = conv(x, w1, b1, padding, dilation)[:, :, :-padding, :-padding]
    out = jnp.maximum(out, 0.0)
    out = conv(out, w2, b2, padding, dilation)[:, :, :-padding, :-padding]
    out = jnp.maximum(out, 0.0)
    res = x if wd is None else conv(x, wd, bd, 0, 1)
    return jnp.maximum(out + res, 0.0)


if __name__ == "__main__":
    N, C_in, C_out, H, W = 2, 4, 8, 16, 16
    K, stride, dilation = 3, 1, 2
    padding = dilation * (K - 1)

    key = jax.random.PRNGKey(0)
    ks = jax.random.split(key, 10)
    x = jax.random.normal(ks[0], (N, C_in, H, W), jnp.float32)
    # init_weights(): weights ~ N(0, 0.01); biases small uniform.
    w1 = 0.01 * jax.random.normal(ks[1], (C_out, C_in, K, K), jnp.float32)
    w2 = 0.01 * jax.random.normal(ks[2], (C_out, C_out, K, K), jnp.float32)
    wd = 0.01 * jax.random.normal(ks[3], (C_out, C_in, 1, 1), jnp.float32)
    b1 = jax.random.uniform(ks[4], (C_out,), jnp.float32, -0.1, 0.1)
    b2 = jax.random.uniform(ks[5], (C_out,), jnp.float32, -0.1, 0.1)
    bd = jax.random.uniform(ks[6], (C_out,), jnp.float32, -0.1, 0.1)
    params = (w1, b1, w2, b2, wd, bd)

    out = temporal_block_2d(x, params, kernel_size=K, stride=stride,
                            dilation=dilation, padding=padding)
    out = jax.block_until_ready(out)
    ref = reference(x, params, kernel_size=K, stride=stride,
                    dilation=dilation, padding=padding)
    # bf16 MXU matmuls / bf16 activations vs. a pure-f32 reference.
    np.testing.assert_allclose(np.asarray(out), np.asarray(ref),
                               rtol=2e-2, atol=1e-2)

    # identity-residual path (n_inputs == n_outputs, downsample is None)
    C = C_out
    x2 = jax.random.normal(ks[7], (N, C, H, W), jnp.float32)
    w1b = 0.01 * jax.random.normal(ks[8], (C, C, K, K), jnp.float32)
    w2b = 0.01 * jax.random.normal(ks[9], (C, C, K, K), jnp.float32)
    params2 = (w1b, b1, w2b, b2, None, None)
    out2 = temporal_block_2d(x2, params2, kernel_size=K, stride=stride,
                             dilation=dilation, padding=padding)
    out2 = jax.block_until_ready(out2)
    ref2 = reference(x2, params2, kernel_size=K, stride=stride,
                     dilation=dilation, padding=padding)
    np.testing.assert_allclose(np.asarray(out2), np.asarray(ref2),
                               rtol=2e-2, atol=1e-2)

    print("KERNEL_OK")
</pallas_src>

<mosaic_0001>
module attributes {stable_mosaic.version = 11 : i64} {
  func.func @_temporal_block_kernel(%arg0: i32, %arg1: memref<1x8x512xbf16, #tpu.memory_space<vmem>>, %arg2: memref<1x384xf32, #tpu.memory_space<vmem>>, %arg3: memref<8x72xbf16, #tpu.memory_space<vmem>>, %arg4: memref<8x1xf32, #tpu.memory_space<vmem>>, %arg5: memref<8x72xbf16, #tpu.memory_space<vmem>>, %arg6: memref<8x1xf32, #tpu.memory_space<vmem>>, %arg7: memref<8x8xbf16, #tpu.memory_space<vmem>>, %arg8: memref<8x1xf32, #tpu.memory_space<vmem>>, %arg9: memref<1x8x384xf32, #tpu.memory_space<vmem>>, %arg10: memref<8x512xbf16, #tpu.memory_space<vmem>>) attributes {dimension_semantics = [#tpu.dimension_semantics<parallel>], iteration_bounds = array<i64: 2>, scalar_prefetch = 0 : i64, scratch_operands = 1 : i64, tpu.core_type = #tpu.core_type<tc>, window_params = [{transform_indices = @transform_0, window_bounds = array<i64: 1, 8, 512>}, {pipeline_mode = #tpu.pipeline_mode<synchronous>, transform_indices = @transform_1, window_bounds = array<i64: 1, 384>}, {pipeline_mode = #tpu.pipeline_mode<synchronous>, transform_indices = @transform_2, window_bounds = array<i64: 8, 72>}, {pipeline_mode = #tpu.pipeline_mode<synchronous>, transform_indices = @transform_3, window_bounds = array<i64: 8, 1>}, {pipeline_mode = #tpu.pipeline_mode<synchronous>, transform_indices = @transform_4, window_bounds = array<i64: 8, 72>}, {pipeline_mode = #tpu.pipeline_mode<synchronous>, transform_indices = @transform_5, window_bounds = array<i64: 8, 1>}, {pipeline_mode = #tpu.pipeline_mode<synchronous>, transform_indices = @transform_6, window_bounds = array<i64: 8, 8>}, {pipeline_mode = #tpu.pipeline_mode<synchronous>, transform_indices = @transform_7, window_bounds = array<i64: 8, 1>}, {transform_indices = @transform_8, window_bounds = array<i64: 1, 8, 384>}]} {
    %c0 = arith.constant 0 : index
    %c0_0 = arith.constant 0 : index
    %c0_1 = arith.constant 0 : index
    %0 = vector.load %arg1[%c0, %c0_0, %c0_1] : memref<1x8x512xbf16, #tpu.memory_space<vmem>>, vector<1x8x384xbf16>
    %1 = vector.shape_cast %0 : vector<1x8x384xbf16> to vector<8x384xbf16>
    %c0_2 = arith.constant 0 : index
    %c0_3 = arith.constant 0 : index
    %c2 = arith.constant 2 : index
    %2 = vector.load %arg1[%c0_2, %c0_3, %c2] : memref<1x8x512xbf16, #tpu.memory_space<vmem>>, vector<1x8x384xbf16>
    %3 = vector.shape_cast %2 : vector<1x8x384xbf16> to vector<8x384xbf16>
    %c0_4 = arith.constant 0 : index
    %c0_5 = arith.constant 0 : index
    %c4 = arith.constant 4 : index
    %4 = vector.load %arg1[%c0_4, %c0_5, %c4] : memref<1x8x512xbf16, #tpu.memory_space<vmem>>, vector<1x8x384xbf16>
    %5 = vector.shape_cast %4 : vector<1x8x384xbf16> to vector<8x384xbf16>
    %c0_6 = arith.constant 0 : index
    %c0_7 = arith.constant 0 : index
    %c40 = arith.constant 40 : index
    %6 = vector.load %arg1[%c0_6, %c0_7, %c40] : memref<1x8x512xbf16, #tpu.memory_space<vmem>>, vector<1x8x384xbf16>
    %7 = vector.shape_cast %6 : vector<1x8x384xbf16> to vector<8x384xbf16>
    %c0_8 = arith.constant 0 : index
    %c0_9 = arith.constant 0 : index
    %c42 = arith.constant 42 : index
    %8 = vector.load %arg1[%c0_8, %c0_9, %c42] : memref<1x8x512xbf16, #tpu.memory_space<vmem>>, vector<1x8x384xbf16>
    %9 = vector.shape_cast %8 : vector<1x8x384xbf16> to vector<8x384xbf16>
    %c0_10 = arith.constant 0 : index
    %c0_11 = arith.constant 0 : index
    %c44 = arith.constant 44 : index
    %10 = vector.load %arg1[%c0_10, %c0_11, %c44] : memref<1x8x512xbf16, #tpu.memory_space<vmem>>, vector<1x8x384xbf16>
    %11 = vector.shape_cast %10 : vector<1x8x384xbf16> to vector<8x384xbf16>
    %c0_12 = arith.constant 0 : index
    %c0_13 = arith.constant 0 : index
    %c80 = arith.constant 80 : index
    %12 = vector.load %arg1[%c0_12, %c0_13, %c80] : memref<1x8x512xbf16, #tpu.memory_space<vmem>>, vector<1x8x384xbf16>
    %13 = vector.shape_cast %12 : vector<1x8x384xbf16> to vector<8x384xbf16>
    %c0_14 = arith.constant 0 : index
    %c0_15 = arith.constant 0 : index
    %c82 = arith.constant 82 : index
    %14 = vector.load %arg1[%c0_14, %c0_15, %c82] : memref<1x8x512xbf16, #tpu.memory_space<vmem>>, vector<1x8x384xbf16>
    %15 = vector.shape_cast %14 : vector<1x8x384xbf16> to vector<8x384xbf16>
    %c0_16 = arith.constant 0 : index
    %c0_17 = arith.constant 0 : index
    %c84 = arith.constant 84 : index
    %16 = vector.load %arg1[%c0_16, %c0_17, %c84] : memref<1x8x512xbf16, #tpu.memory_space<vmem>>, vector<1x8x384xbf16>
    %17 = vector.shape_cast %16 : vector<1x8x384xbf16> to vector<8x384xbf16>
    %18 = tpu.concatenate %1, %3, %5, %7, %9, %11, %13, %15, %17 in 0 : vector<8x384xbf16>, vector<8x384xbf16>, vector<8x384xbf16>, vector<8x384xbf16>, vector<8x384xbf16>, vector<8x384xbf16>, vector<8x384xbf16>, vector<8x384xbf16>, vector<8x384xbf16> -> vector<72x384xbf16>
    %c0_18 = arith.constant 0 : index
    %c0_19 = arith.constant 0 : index
    %19 = vector.load %arg3[%c0_18, %c0_19] : memref<8x72xbf16, #tpu.memory_space<vmem>>, vector<8x72xbf16>
    %cst = arith.constant dense<0.000000e+00> : vector<8x384xf32>
    %20 = tpu.matmul %19, %18, %cst {dimension_numbers = #tpu.dot_dimension_numbers<[1], [0], [0], [1], [0, 0, 1, 1], [], []>} : vector<8x72xbf16>, vector<72x384xbf16>, vector<8x384xf32> -> vector<8x384xf32>
    %c0_20 = arith.constant 0 : index
    %c0_21 = arith.constant 0 : index
    %21 = vector.load %arg4[%c0_20, %c0_21] : memref<8x1xf32, #tpu.memory_space<vmem>>, vector<8x1xf32>
    %22 = vector.broadcast %21 : vector<8x1xf32> to vector<8x384xf32>
    %23 = arith.addf %20, %22 : vector<8x384xf32>
    %cst_22 = arith.constant 0.000000e+00 : f32
    %24 = vector.broadcast %cst_22 : f32 to vector<8x384xf32>
    %25 = arith.maximumf %23, %24 : vector<8x384xf32>
    %cst_23 = arith.constant 0.000000e+00 : bf16
    %26 = vector.broadcast %cst_23 : bf16 to vector<8x128xbf16>
    %c0_24 = arith.constant 0 : index
    %c0_25 = arith.constant 0 : index
    %27 = vector.load %arg10[%c0_24, %c0_25] : memref<8x512xbf16, #tpu.memory_space<vmem>>, vector<8x128xbf16>
    tpu.vector_store %arg10[%c0_24, %c0_25], %26 {strides = array<i32>} : memref<8x512xbf16, #tpu.memory_space<vmem>>, vector<8x128xbf16>,
    %c0_26 = arith.constant 0 : index
    %c0_27 = arith.constant 0 : index
    %28 = vector.load %arg2[%c0_26, %c0_27] : memref<1x384xf32, #tpu.memory_space<vmem>>, vector<1x384xf32>
    %29 = vector.broadcast %28 : vector<1x384xf32> to vector<8x384xf32>
    %30 = arith.mulf %25, %29 : vector<8x384xf32>
    %31 = arith.truncf %30 : vector<8x384xf32> to vector<8x384xbf16>
    %c0_28 = arith.constant 0 : index
    %c128 = arith.constant 128 : index
    %32 = vector.load %arg10[%c0_28, %c128] : memref<8x512xbf16, #tpu.memory_space<vmem>>, vector<8x384xbf16>
    tpu.vector_store %arg10[%c0_28, %c128], %31 {strides = array<i32>} : memref<8x512xbf16, #tpu.memory_space<vmem>>, vector<8x384xbf16>,
    %c0_29 = arith.constant 0 : index
    %c44_30 = arith.constant 44 : index
    %33 = vector.load %arg10[%c0_29, %c44_30] : memref<8x512xbf16, #tpu.memory_space<vmem>>, vector<8x384xbf16>
    %c0_31 = arith.constant 0 : index
    %c46 = arith.constant 46 : index
    %34 = vector.load %arg10[%c0_31, %c46] : memref<8x512xbf16, #tpu.memory_space<vmem>>, vector<8x384xbf16>
    %c0_32 = arith.constant 0 : index
    %c48 = arith.constant 48 : index
    %35 = vector.load %arg10[%c0_32, %c48] : memref<8x512xbf16, #tpu.memory_space<vmem>>, vector<8x384xbf16>
    %c0_33 = arith.constant 0 : index
    %c84_34 = arith.constant 84 : index
    %36 = vector.load %arg10[%c0_33, %c84_34] : memref<8x512xbf16, #tpu.memory_space<vmem>>, vector<8x384xbf16>
    %c0_35 = arith.constant 0 : index
    %c86 = arith.constant 86 : index
    %37 = vector.load %arg10[%c0_35, %c86] : memref<8x512xbf16, #tpu.memory_space<vmem>>, vector<8x384xbf16>
    %c0_36 = arith.constant 0 : index
    %c88 = arith.constant 88 : index
    %38 = vector.load %arg10[%c0_36, %c88] : memref<8x512xbf16, #tpu.memory_space<vmem>>, vector<8x384xbf16>
    %c0_37 = arith.constant 0 : index
    %c124 = arith.constant 124 : index
    %39 = vector.load %arg10[%c0_37, %c124] : memref<8x512xbf16, #tpu.memory_space<vmem>>, vector<8x384xbf16>
    %c0_38 = arith.constant 0 : index
    %c126 = arith.constant 126 : index
    %40 = vector.load %arg10[%c0_38, %c126] : memref<8x512xbf16, #tpu.memory_space<vmem>>, vector<8x384xbf16>
    %c0_39 = arith.constant 0 : index
    %c128_40 = arith.constant 128 : index
    %41 = vector.load %arg10[%c0_39, %c128_40] : memref<8x512xbf16, #tpu.memory_space<vmem>>, vector<8x384xbf16>
    %42 = tpu.concatenate %33, %34, %35, %36, %37, %38, %39, %40, %41 in 0 : vector<8x384xbf16>, vector<8x384xbf16>, vector<8x384xbf16>, vector<8x384xbf16>, vector<8x384xbf16>, vector<8x384xbf16>, vector<8x384xbf16>, vector<8x384xbf16>, vector<8x384xbf16> -> vector<72x384xbf16>
    %c0_41 = arith.constant 0 : index
    %c0_42 = arith.constant 0 : index
    %43 = vector.load %arg5[%c0_41, %c0_42] : memref<8x72xbf16, #tpu.memory_space<vmem>>, vector<8x72xbf16>
    %cst_43 = arith.constant dense<0.000000e+00> : vector<8x384xf32>
    %44 = tpu.matmul %43, %42, %cst_43 {dimension_numbers = #tpu.dot_dimension_numbers<[1], [0], [0], [1], [0, 0, 1, 1], [], []>} : vector<8x72xbf16>, vector<72x384xbf16>, vector<8x384xf32> -> vector<8x384xf32>
    %c0_44 = arith.constant 0 : index
    %c0_45 = arith.constant 0 : index
    %45 = vector.load %arg6[%c0_44, %c0_45] : memref<8x1xf32, #tpu.memory_space<vmem>>, vector<8x1xf32>
    %46 = vector.broadcast %45 : vector<8x1xf32> to vector<8x384xf32>
    %47 = arith.addf %44, %46 : vector<8x384xf32>
    %cst_46 = arith.constant 0.000000e+00 : f32
    %48 = vector.broadcast %cst_46 : f32 to vector<8x384xf32>
    %49 = arith.maximumf %47, %48 : vector<8x384xf32>
    %c0_47 = arith.constant 0 : index
    %c0_48 = arith.constant 0 : index
    %c84_49 = arith.constant 84 : index
    %50 = vector.load %arg1[%c0_47, %c0_48, %c84_49] : memref<1x8x512xbf16, #tpu.memory_space<vmem>>, vector<1x8x384xbf16>
    %51 = vector.shape_cast %50 : vector<1x8x384xbf16> to vector<8x384xbf16>
    %c0_50 = arith.constant 0 : index
    %c0_51 = arith.constant 0 : index
    %52 = vector.load %arg7[%c0_50, %c0_51] : memref<8x8xbf16, #tpu.memory_space<vmem>>, vector<8x8xbf16>
    %cst_52 = arith.constant dense<0.000000e+00> : vector<8x384xf32>
    %53 = tpu.matmul %52, %51, %cst_52 {dimension_numbers = #tpu.dot_dimension_numbers<[1], [0], [0], [1], [0, 0, 1, 1], [], []>} : vector<8x8xbf16>, vector<8x384xbf16>, vector<8x384xf32> -> vector<8x384xf32>
    %c0_53 = arith.constant 0 : index
    %c0_54 = arith.constant 0 : index
    %54 = vector.load %arg8[%c0_53, %c0_54] : memref<8x1xf32, #tpu.memory_space<vmem>>, vector<8x1xf32>
    %55 = vector.broadcast %54 : vector<8x1xf32> to vector<8x384xf32>
    %56 = arith.addf %53, %55 : vector<8x384xf32>
    %57 = arith.addf %49, %56 : vector<8x384xf32>
    %cst_55 = arith.constant 0.000000e+00 : f32
    %58 = vector.broadcast %cst_55 : f32 to vector<8x384xf32>
    %59 = arith.maximumf %57, %58 : vector<8x384xf32>
    %c0_56 = arith.constant 0 : index
    %c0_57 = arith.constant 0 : index
    %c0_58 = arith.constant 0 : index
    %60 = vector.load %arg9[%c0_56, %c0_57, %c0_58] : memref<1x8x384xf32, #tpu.memory_space<vmem>>, vector<1x8x384xf32>
    %61 = vector.shape_cast %60 : vector<1x8x384xf32> to vector<8x384xf32>
    %62 = vector.shape_cast %59 : vector<8x384xf32> to vector<1x8x384xf32>
    tpu.vector_store %arg9[%c0_56, %c0_57, %c0_58], %62 {strides = array<i32>} : memref<1x8x384xf32, #tpu.memory_space<vmem>>, vector<1x8x384xf32>,
    return
  }
  func.func @transform_0(%arg0: i32) -> (i32, i32, i32) {
    %c0_i32 = arith.constant 0 : i32
    %c0_i32_0 = arith.constant 0 : i32
    %c0_i32_1 = arith.constant 0 : i32
    return %arg0, %c0_i32, %c0_i32_0 : i32, i32, i32
  }
  func.func @transform_1(%arg0: i32) -> (i32, i32) {
    %c0_i32 = arith.constant 0 : i32
    %c0_i32_0 = arith.constant 0 : i32
    %c0_i32_1 = arith.constant 0 : i32
    return %c0_i32, %c0_i32_0 : i32, i32
  }
  func.func @transform_2(%arg0: i32) -> (i32, i32) {
    %c0_i32 = arith.constant 0 : i32
    %c0_i32_0 = arith.constant 0 : i32
    %c0_i32_1 = arith.constant 0 : i32
    return %c0_i32, %c0_i32_0 : i32, i32
  }
  func.func @transform_3(%arg0: i32) -> (i32, i32) {
    %c0_i32 = arith.constant 0 : i32
    %c0_i32_0 = arith.constant 0 : i32
    %c0_i32_1 = arith.constant 0 : i32
    return %c0_i32, %c0_i32_0 : i32, i32
  }
  func.func @transform_4(%arg0: i32) -> (i32, i32) {
    %c0_i32 = arith.constant 0 : i32
    %c0_i32_0 = arith.constant 0 : i32
    %c0_i32_1 = arith.constant 0 : i32
    return %c0_i32, %c0_i32_0 : i32, i32
  }
  func.func @transform_5(%arg0: i32) -> (i32, i32) {
    %c0_i32 = arith.constant 0 : i32
    %c0_i32_0 = arith.constant 0 : i32
    %c0_i32_1 = arith.constant 0 : i32
    return %c0_i32, %c0_i32_0 : i32, i32
  }
  func.func @transform_6(%arg0: i32) -> (i32, i32) {
    %c0_i32 = arith.constant 0 : i32
    %c0_i32_0 = arith.constant 0 : i32
    %c0_i32_1 = arith.constant 0 : i32
    return %c0_i32, %c0_i32_0 : i32, i32
  }
  func.func @transform_7(%arg0: i32) -> (i32, i32) {
    %c0_i32 = arith.constant 0 : i32
    %c0_i32_0 = arith.constant 0 : i32
    %c0_i32_1 = arith.constant 0 : i32
    return %c0_i32, %c0_i32_0 : i32, i32
  }
  func.func @transform_8(%arg0: i32) -> (i32, i32, i32) {
    %c0_i32 = arith.constant 0 : i32
    %c0_i32_0 = arith.constant 0 : i32
    %c0_i32_1 = arith.constant 0 : i32
    return %arg0, %c0_i32, %c0_i32_0 : i32, i32, i32
  }
}

</mosaic_0001>

<bundles_post_ra>
// kernel: tpu_custom_call.1
= control target key start
LH: loop header
LB: loop body
LE: loop exit
PB: predicated region body
PF: predicated region fallthrough
CT: control target
= control target key end

     0   :  { %13 = vsyncpa [#allocation4], 0  ;;  %s1997_s0 = inlined_call_operand.hbm [shape: bf16[2,8,512], index: 0, kind: input, shape index: {}]   ;;  %s1998_s1 = inlined_call_operand.vmem [shape: f32[1,384], index: 1, kind: input, shape index: {}]   ;;  %s1999_s2 = inlined_call_operand.vmem [shape: bf16[8,72], index: 2, kind: input, shape index: {}]   ;;  %s2000_s3 = inlined_call_operand.vmem [shape: f32[8,1], index: 3, kind: input, shape index: {}]   ;;  %s2001_s4 = inlined_call_operand.vmem [shape: bf16[8,72], index: 4, kind: input, shape index: {}]   ;;  %s2002_s5 = inlined_call_operand.vmem [shape: f32[8,1], index: 5, kind: input, shape index: {}]   ;;  %s2003_s6 = inlined_call_operand.vmem [shape: bf16[8,8], index: 6, kind: input, shape index: {}]   ;;  %s2004_s7 = inlined_call_operand.vmem [shape: f32[8,1], index: 7, kind: input, shape index: {}]   ;;  %s2005_s8 = inlined_call_operand.hbm [shape: f32[2,8,384], index: 8, kind: output, shape index: {}]  }
   0x1   :  { %15 = vsyncpa [#allocation4 + $0x1], 0 }
   0x2   :  { %16 = vsyncpa [#allocation5], 0 }
   0x3   :  { %18 = vsyncpa [#allocation5 + $0x1], 0  ;;  %s1509_s27 = smov 0   ;;  %s1511_s28 = smov 0  }
   0x4   :  { %s1513_s29 = smov 0   ;;  %s1515_s30 = smov 0  }
   0x5 LB: > { %s1530_s9 = sadd.s32 4294967295, %s1449_s30   ;;  %s1189_s10 = sadd.s32 4294967294, %s1449_s30   ;;  %s1449_s30 = sphi %s1515_s30, %s2020_s30   ;;  %s1445_s29 = sphi %s1513_s29, %s2019_s29   ;;  %s1441_s28 = sphi %s1511_s28, %s2018_s28   ;;  %s1437_s27 = sphi %s1509_s27, %s2017_s27  }
   0x6   : > { %s1534_s11 = sadd.s32 1, %s1449_s30   ;;  %s31_s12 = sadd.s32 1, %s1445_s29 }
   0x7   : > { %s28_s13 = ssub.s32 %s1449_s30, %s1534_s11  ;;  %p38_p0 = scmp.ne.s32.totalorder %s1445_s29, %s1441_s28 }
   0x8   : > { %p29_p1 = scmp.eq.s32.totalorder %s28_s13, 0  ;;  %p39_p2 = scmp.eq.s32.totalorder %s1449_s30, 0 }
   0x9   : > { %p44_p3 = scmp.ne.s32.totalorder %s1441_s28, %s1437_s27  ;;  %p45_p4 = scmp.eq.s32.totalorder %s1530_s9, 0 }
   0xa   : > { %s1546_s14 = scalar_select %p29_p1, %s1445_s29, %s31_s12  }
   0xb   : > { %p1548_p5 = por %p39_p2, %p38_p0  ;;  %p1552_p6 = por %p45_p4, %p44_p3 }
   0xc   : > { %p215_p7 = scmp.eq.s32.totalorder %s1530_s9, 1  ;;  %p221_p8 = scmp.eq.s32.totalorder %s1189_s10, 1 }
   0xd   : > { %p1294_p10 = scmp.lt.s32.totalorder %s1449_s30, 2  ;;  %s262_s19 = sand.u32 1, %s1445_s29  }
   0xe   : > { %p1559_p11 = por %p215_p7, %p38_p0  ;;  %p1563_p12 = por %p221_p8, %p44_p3 }
   0xf   : > { %s1229_s20 = sshll.u32 %s1449_s30, 8  ;;  %s1192_s21 = sshll.u32 %s262_s19, 4 }
  0x10   : > { %s2009_s17 = scalar_select %p1559_p11, 1, 0 }
  0x11   : > { %s2010_s18 = scalar_select %p1563_p12, 1, 0 }
  0x12   : > { %s1572_s24 = scalar_lea.hbm %s1997_s0, %s1229_s20  ;;  %s266_s25 = scalar_lea.vmem [#allocation3], %s1192_s21 }
  0x13   : > { %s274_s26 = sshll.u32 %s266_s25, 4  ;;  %p1576_p13 = pnand %p1294_p10, %p1548_p5  ;;  %s1580_s26 = int_to_ptr.vmem [resolvable:$true] %s274_s26 }
  0x14   : > { %s263_s12 = scalar_lea.sflag [#allocation4], %s262_s19  ;;  %s1353_s13 = scalar_lea.hbm %s1572_s24, 256 }
  0x15   : > { %p1354_p2 = scmp.ne.s32.totalorder %s1572_s24, %s1353_s13  ;;  %p1355_p3 = pneg %p1576_p13 }
  0x16   : > { %s1358_s21 = scalar_lea.hbm %s1997_s0, 512  ;;  %p1359_p5 = scmp.lt.u32.totalorder %s1572_s24, %s1997_s0 }
  0x17   : > { %p1356_p4 = pnand %p1355_p3, %p1354_p2  ;;  %p1360_p8 = scmp.lt.u32.totalorder %s1358_s21, %s1353_s13 }
  0x18   : > { %p1362_p9 = scmp.lt.u32.totalorder %s1353_s13, %s1572_s24 }
  0x19   : > { %p1357_p7 = pneg %p1356_p4  ;;  %p1361_p10 = por %p1360_p8, %p1359_p5 }
  0x1b   : > { %p1363_p0 = por %p1362_p9, %p1361_p10 }
  0x1d   : > { %p1364_p1 = pnand %p1363_p0, %p1357_p7 }
  0x1f   : > { %1367 = shalt.err (!%p1364_p1)
}
  0x20   : > { %s1368_s19 = scalar_lea.vmem %s1580_s26, 256  ;;  %s1451_s25 = smov [#allocation3]  }
  0x21   : > { %p1369_p2 = scmp.ne.s32.totalorder %s1580_s26, %s1368_s19  ;;  %s1373_s15 = sshll.u32 %s1451_s25, 4  ;;  %s1374_s15 = int_to_ptr.vmem [resolvable:$false] %s1373_s15 }
  0x22   : > { %s1375_s20 = scalar_lea.vmem %s1374_s15, 512  ;;  %p1376_p11 = scmp.lt.s32.totalorder %s1580_s26, %s1374_s15 }
  0x23   : > { %p1371_p4 = pnand %p1369_p2, %p1355_p3  ;;  %p1377_p5 = scmp.lt.s32.totalorder %s1375_s20, %s1368_s19 }
  0x25   : > { %p1372_p12 = pneg %p1371_p4  ;;  %p1378_p8 = por %p1377_p5, %p1376_p11 }
  0x27   : > { %p1379_p9 = pnand %p1378_p8, %p1372_p12 }
  0x29   : > { %1382 = shalt.err (!%p1379_p9)
}
  0x2a   : > { %1289 = dma.hbm_to_vmem [thread:$0]  (!%p1576_p13), %s1572_s24, 256, %s1580_s26, %s263_s12  }
  0x2b   : > { %p2012_p0 = scmp.lt.s32.totalorder %s1449_s30, 3  ;;  %p2013_p1 = scmp.ge.s32.totalorder %s1449_s30, 1 }
  0x2d   : > { %p280_p3 = pnand %p2013_p1, %p2012_p0 }
  0x2e   : > { %s1614_s13 = sand.u32 (!%p280_p3), 1, %s1441_s28  }
  0x2f   : > { %283 = sbr.rel (%p280_p3) target bundleno = 1033 (0x409), region = 52  ;;  %s1196_s21 = sshll.u32 (!%p280_p3), %s1614_s13, 4 }
  0x30   : > { %s286_s22 = scalar_lea.sflag (!%p280_p3), [#allocation4], %s1614_s13  ;;  %s1618_s23 = scalar_lea.vmem (!%p280_p3), [#allocation3], %s1196_s21 }
  0x36   : > { %1428 = dma.done.wait (%p1552_p6), %s286_s22, 256  }
  0x37   : > { %1430 = vsyncadd (%p1552_p6), %s286_s22, 4294967040  ;;  %v1452_v0 = vmov 0.0   ;;  %v325_v1 = vld [vmem:[%s1618_s23] sm:$0xff]  ;;  %v326_v2 = vld [vmem:[%s1618_s23 + $0x8] sm:$0xff]  ;;  %s1453_s24 = smov 126   ;;  %s1454_s16 = smov 124  }
  0x38   : > { %1246 = vmatprep.subr.bf16.mxu1 %v1452_v0  ;;  %v1627_v3 = vcombine.high %v325_v1, %v325_v1  ;;  %v1629_v4 = vcombine.low %v325_v1, %v325_v1  ;;  %v1635_v5 = vcombine.low %v326_v2, %v326_v2  ;;  %v1637_v6 = vcombine.high %v326_v2, %v326_v2  ;;  %s1455_s26 = smov 88   ;;  %s1456_s10 = smov 86   ;;  %v491_v8 = vld [vmem:[%s2000_s3] sm:$0xff]  ;;  %v1345_v11 = vld [vmem:[%s1618_s23 + $0x8] ss:$0 sps:$4 sm:$0xff]  }
  0x39   : > { %s1457_s12 = smov 84   ;;  %s1458_s19 = smov 48   ;;  %v1460_v7 = vmov 0   ;;  %vm1461_vm0 = vmmov 0   ;;  %vm353_vm1 = vcmask 1031168   ;;  %vm441_vm2 = vcmask 1043456  }
  0x3a   : > { %347 = vrot.lane.b32.xlu0 %v1627_v3, %s1453_s24  ;;  %345 = vrot.lane.b32.xlu1 %v1629_v4, %s1453_s24  ;;  %s1459_s25 = smov 46   ;;  %594 = vst [vmem:[#allocation2] sm:$0xf] %v1460_v7  ;;  %s1462_s15 = smov 44   ;;  %vm365_vm3 = vcmask 1014784   ;;  %vm377_vm4 = vcmask 719872  }
  0x3b   : > { %542 = vmatprep.mubr.bf16.mxu0 %v1460_v7  ;;  %1256 = vmatprep.mubr.msk.bf16.mxu1 %vm1461_vm0, %v1452_v0  ;;  %vm389_vm5 = vcmask 703488   ;;  %vm401_vm6 = vcmask 687104   ;;  %vm413_vm7 = vcmask 392192   ;;  %vm425_vm8 = vcmask 375808   ;;  %s1280_s22 = smul.u32 24, %s1614_s13  ;;  %p2014_p11 = scmp.ne.s32.totalorder %s2009_s17, 0 }
  0x3c   : > { %1339 = vset.pattern.permute.xlu0 %v1460_v7  ;;  %1340 = vset.pattern.permute.xlu1 %v1460_v7  ;;  %vm437_vm9 = vcmask 359424   ;;  %vm497_vm10 = vcmask 588800   ;;  %vm1001_vm11 = vcmask 64512   ;;  %s1281_s23 = smul.u32 384, %s1530_s9  ;;  %s1105_s9 = scalar_lea.sflag [#allocation5], %s1614_s13 }
  0x3d   : > { %s321_s20 = scalar_lea.vmem [#allocation6], %s1280_s22 }
  0x3e   : > { %349 = vrot.lane.b32.xlu0 %v1635_v5, %s1453_s24  ;;  %351 = vrot.lane.b32.xlu1 %v1637_v6, %s1453_s24  ;;  %s1119_s21 = sshll.u32 %s321_s20, 4  ;;  %s1955_s21 = int_to_ptr.vmem [resolvable:$true] %s1119_s21 }
  0x42   : > { %359 = vrot.lane.b32.xlu0 %v1627_v3, %s1454_s16  ;;  %361 = vrot.lane.b32.xlu1 %v1635_v5, %s1454_s16 }
  0x46   : > { %371 = vrot.lane.b32.xlu0 %v1627_v3, %s1455_s26  ;;  %373 = vrot.lane.b32.xlu1 %v1635_v5, %s1455_s26 }
  0x4a   : > { %357 = vrot.lane.b32.xlu0 %v1629_v4, %s1454_s16  ;;  %369 = vrot.lane.b32.xlu1 %v1629_v4, %s1455_s26 }
  0x4e   : > { %363 = vrot.lane.b32.xlu0 %v1637_v6, %s1454_s16  ;;  %375 = vrot.lane.b32.xlu1 %v1637_v6, %s1455_s26 }
  0x52   : > { %383 = vrot.lane.b32.xlu0 %v1627_v3, %s1456_s10  ;;  %385 = vrot.lane.b32.xlu1 %v1635_v5, %s1456_s10 }
  0x56   : > { %395 = vrot.lane.b32.xlu0 %v1627_v3, %s1457_s12  ;;  %397 = vrot.lane.b32.xlu1 %v1635_v5, %s1457_s12 }
  0x5a   : > { %381 = vrot.lane.b32.xlu0 %v1629_v4, %s1456_s10  ;;  %393 = vrot.lane.b32.xlu1 %v1629_v4, %s1457_s12 }
  0x5e   : > { %387 = vrot.lane.b32.xlu0 %v1637_v6, %s1456_s10  ;;  %399 = vrot.lane.b32.xlu1 %v1637_v6, %s1457_s12 }
  0x62   : > { %407 = vrot.lane.b32.xlu0 %v1627_v3, %s1458_s19  ;;  %409 = vrot.lane.b32.xlu1 %v1635_v5, %s1458_s19 }
  0x66   : > { %419 = vrot.lane.b32.xlu0 %v1627_v3, %s1459_s25  ;;  %421 = vrot.lane.b32.xlu1 %v1635_v5, %s1459_s25 }
  0x6a   : > { %405 = vrot.lane.b32.xlu0 %v1629_v4, %s1458_s19  ;;  %417 = vrot.lane.b32.xlu1 %v1629_v4, %s1459_s25 }
  0x6e   : > { %411 = vrot.lane.b32.xlu0 %v1637_v6, %s1458_s19  ;;  %423 = vrot.lane.b32.xlu1 %v1637_v6, %s1459_s25 }
  0x72   : > { %429 = vrot.lane.b32.xlu0 %v1629_v4, %s1462_s15  ;;  %431 = vrot.lane.b32.xlu1 %v1627_v3, %s1462_s15 }
  0x76   : > { %433 = vrot.lane.b32.xlu0 %v1635_v5, %s1462_s15  ;;  %435 = vrot.lane.b32.xlu1 %v1637_v6, %s1462_s15 }
  0x7a   : > { %494 = vperm.xlu0 %1339, %v491_v8  }
  0xac   : > { %v348_v9 = vpop.permute.xlu0 %347  ;;  %v346_v10 = vpop.permute.xlu1 %345 }
  0xad   : > { %v354_v12 = vsel %vm353_vm1, %v346_v10, %v348_v9 }
  0xae   : > { %v444_v19 = vsel %vm441_vm2, %v1629_v4, %v354_v12 }
  0xb0   : > { %v350_v13 = vpop.permute.xlu0 %349  ;;  %v352_v14 = vpop.permute.xlu1 %351 }
  0xb1   : > { %v355_v15 = vsel %vm353_vm1, %v348_v9, %v350_v13  ;;  %v356_v16 = vsel %vm353_vm1, %v350_v13, %v352_v14 }
  0xb2   : > { %v448_v17 = vsel %vm441_vm2, %v1627_v3, %v355_v15  ;;  %v452_v18 = vsel %vm441_vm2, %v1345_v11, %v356_v16 }
  0xb3   : > { %510 = vmatprep.subr.bf16.mxu0 %v448_v17  ;;  %1247 = vmatpush3.bf16.msra.mxu1 %v452_v18 }
  0xb4   : > { %v360_v20 = vpop.permute.xlu0 %359  ;;  %v362_v21 = vpop.permute.xlu1 %361  ;;  %511 = vmatpush1.bf16.msra.mxu0 %v444_v19  ;;  %1248 = vmatprep.subr.bf16.mxu1 %v1452_v0 }
  0xb5   : > { %v367_v24 = vsel %vm365_vm3, %v360_v20, %v362_v21 }
  0xb8   : > { %v372_v22 = vpop.permute.xlu0 %371  ;;  %v374_v23 = vpop.permute.xlu1 %373 }
  0xb9   : > { %v379_v25 = vsel %vm377_vm4, %v372_v22, %v374_v23 }
  0xba   : > { %v460_v26 = vsel %vm441_vm2, %v367_v24, %v379_v25 }
  0xbb   : > { %512 = vmatprep.subr.bf16.mxu0 %v460_v26 }
  0xbc   : > { %v358_v27 = vpop.permute.xlu0 %357  ;;  %v370_v28 = vpop.permute.xlu1 %369 }
  0xbd   : > { %v366_v29 = vsel %vm365_vm3, %v358_v27, %v360_v20  ;;  %v378_v30 = vsel %vm377_vm4, %v370_v28, %v372_v22  ;;  %v490_v22 = vld [vmem:[%s1999_s2] sm:$0xf] }
  0xbe   : > { %v456_v31 = vsel %vm441_vm2, %v366_v29, %v378_v30  ;;  %v595_v28 = vld [vmem:[%s1998_s1] sm:$0x7] }
  0xbf   : > { %513 = vmatpush1.bf16.msra.mxu0 %v456_v31 }
  0xc0   : > { %v364_v32 = vpop.permute.xlu0 %363  ;;  %v376_v33 = vpop.permute.xlu1 %375 }
  0xc1   : > { %v368_v34 = vsel %vm365_vm3, %v362_v21, %v364_v32  ;;  %v380_v35 = vsel %vm377_vm4, %v374_v23, %v376_v33  ;;  %v597_v23 = vlaneseq }
  0xc2   : > { %v464_v36 = vsel %vm441_vm2, %v368_v34, %v380_v35 }
  0xc3   : > { %1249 = vmatpush3.bf16.msra.mxu1 %v464_v36  ;;  %v598_v24 = vshrl.u32 %v597_v23, 7 }
  0xc4   : > { %v384_v37 = vpop.permute.xlu0 %383  ;;  %v386_v38 = vpop.permute.xlu1 %385  ;;  %1250 = vmatprep.subr.bf16.mxu1 %v1452_v0 }
  0xc5   : > { %v391_v41 = vsel %vm389_vm5, %v384_v37, %v386_v38  ;;  %v599_v25 = vsub.s32 0, %v598_v24  ;;  %v607_v26 = vsub.s32 2, %v598_v24  ;;  %v603_v29 = vsub.s32 1, %v598_v24 }
  0xc7   : > { %v600_v33 = vrot.slane %v595_v28, %v599_v25  ;;  %v608_v35 = vrot.slane %v595_v28, %v607_v26 }
  0xc8   : > { %v396_v39 = vpop.permute.xlu0 %395  ;;  %v398_v40 = vpop.permute.xlu1 %397 }
  0xc9   : > { %v403_v42 = vsel %vm401_vm6, %v396_v39, %v398_v40 }
  0xca   : > { %v472_v43 = vsel %vm441_vm2, %v391_v41, %v403_v42 }
  0xcb   : > { %514 = vmatprep.subr.bf16.mxu0 %v472_v43 }
  0xcc   : > { %v382_v44 = vpop.permute.xlu0 %381  ;;  %v394_v45 = vpop.permute.xlu1 %393 }
  0xcd   : > { %v390_v46 = vsel %vm389_vm5, %v382_v44, %v384_v37  ;;  %v402_v47 = vsel %vm401_vm6, %v394_v45, %v396_v39  ;;  %v604_v39 = vrot.slane %v595_v28, %v603_v29 }
  0xce   : > { %v468_v48 = vsel %vm441_vm2, %v390_v46, %v402_v47 }
  0xcf   : > { %515 = vmatpush1.bf16.msra.mxu0 %v468_v48 }
  0xd0   : > { %v388_v49 = vpop.permute.xlu0 %387  ;;  %v400_v50 = vpop.permute.xlu1 %399 }
  0xd1   : > { %v392_v51 = vsel %vm389_vm5, %v386_v38, %v388_v49  ;;  %v404_v52 = vsel %vm401_vm6, %v398_v40, %v400_v50 }
  0xd2   : > { %v476_v53 = vsel %vm441_vm2, %v392_v51, %v404_v52 }
  0xd3   : > { %1251 = vmatpush3.bf16.msra.mxu1 %v476_v53 }
  0xd4   : > { %v408_v54 = vpop.permute.xlu0 %407  ;;  %v410_v55 = vpop.permute.xlu1 %409  ;;  %1252 = vmatprep.subr.bf16.mxu1 %v1452_v0 }
  0xd5   : > { %v415_v58 = vsel %vm413_vm7, %v408_v54, %v410_v55 }
  0xd8   : > { %v420_v56 = vpop.permute.xlu0 %419  ;;  %v422_v57 = vpop.permute.xlu1 %421 }
  0xd9   : > { %v427_v59 = vsel %vm425_vm8, %v420_v56, %v422_v57 }
  0xda   : > { %v484_v60 = vsel %vm441_vm2, %v415_v58, %v427_v59 }
  0xdb   : > { %516 = vmatprep.subr.bf16.mxu0 %v484_v60 }
  0xdc   : > { %v406_v61 = vpop.permute.xlu0 %405  ;;  %v418_v62 = vpop.permute.xlu1 %417 }
  0xdd   : > { %v414_v63 = vsel %vm413_vm7, %v406_v61, %v408_v54  ;;  %v426_v1 = vsel %vm425_vm8, %v418_v62, %v420_v56 }
  0xde   : > { %v480_v2 = vsel %vm441_vm2, %v414_v63, %v426_v1 }
  0xdf   : > { %517 = vmatpush1.bf16.msra.mxu0 %v480_v2 }
  0xe0   : > { %v412_v8 = vpop.permute.xlu0 %411  ;;  %v424_v9 = vpop.permute.xlu1 %423 }
  0xe1   : > { %v416_v10 = vsel %vm413_vm7, %v410_v55, %v412_v8  ;;  %v428_v11 = vsel %vm425_vm8, %v422_v57, %v424_v9 }
  0xe2   : > { %v488_v12 = vsel %vm441_vm2, %v416_v10, %v428_v11 }
  0xe3   : > { %1253 = vmatpush3.bf16.msra.mxu1 %v488_v12 }
  0xe4   : > { %v430_v13 = vpop.permute.xlu0 %429  ;;  %v432_v14 = vpop.permute.xlu1 %431  ;;  %1254 = vmatprep.subr.bf16.mxu1 %v1452_v0 }
  0xe5   : > { %v438_v15 = vsel %vm437_vm9, %v430_v13, %v432_v14 }
  0xe6   : > { %v502_v20 = vsel %vm441_vm2, %v438_v15, 0 }
  0xe8   : > { %v434_v16 = vpop.permute.xlu0 %433  ;;  %v436_v17 = vpop.permute.xlu1 %435 }
  0xe9   : > { %v439_v18 = vsel %vm437_vm9, %v432_v14, %v434_v16  ;;  %v440_v19 = vsel %vm437_vm9, %v434_v16, %v436_v17 }
  0xea   : > { %1204 = vmatprep.subr.msk.bf16.mxu0 %vm441_vm2, %v439_v18  ;;  %v508_v21 = vsel %vm441_vm2, %v440_v19, 0 }
  0xeb   : > { %519 = vmatpush1.bf16.msra.mxu0 %v502_v20  ;;  %1255 = vmatpush3.bf16.msra.mxu1 %v508_v21 }
  0xec   : > { %1260 = vmatprep.subr.bf16.mxu1 %v1452_v0 }
  0xee   : > { %1205 = vmatmul.mubr.msk.bf16.vlgmr.msra.gmra.mrb[0].mxu0 %vm497_vm10, %v490_v22  ;;  %1257 = vmatmul.mubr.msk.bf16.vlgmr.msra.gmra.mrb[0].mxu1 %vm497_vm10, %v490_v22 }
  0xef   : > { %919 = vmatprep.mubr.bf16.mxu0 %v1460_v7  ;;  %1270 = vmatprep.mubr.msk.bf16.mxu1 %vm1461_vm0, %v1452_v0 }
  0xf9   : > { %v495_v27 = vpop.permute.xlu0 %494 }
 0x1c1   : > { %v544_v30 = vpop.f32.mrb[0].mxu0  ;;  %v585_v31 = vpop.f32.mrb[0].mxu1 }
 0x1c2   : > { %v545_v32 = vadd.f32 %v544_v30, %v495_v27  ;;  %v586_v34 = vadd.f32 %v585_v31, %v495_v27  ;;  %v546_v36 = vpop.f32.mrb[1].mxu0  ;;  %v1258_v37 = vpop.f32.mrb[1].mxu1 }
 0x1c3   : > { %v547_v38 = vadd.f32 %v546_v36, %v495_v27  ;;  %v548_v40 = vpop.f32.mrb[2].mxu0  ;;  %v588_v41 = vpop.f32.mrb[2].mxu1 }
 0x1c4   : > { %v591_v42 = vmax.f32 %v545_v32, 0.0  ;;  %v593_v43 = vmax.f32 %v586_v34, 0.0  ;;  %v549_v44 = vpop.f32.mrb[3].mxu0  ;;  %v1259_v45 = vpop.f32.mrb[3].mxu1 }
 0x1c5   : > { %v592_v46 = vmax.f32 %v547_v38, 0.0 }
 0x1c6   : > { %v612_v47 = vmul.f32 %v600_v33, %v591_v42  ;;  %v614_v48 = vmul.f32 %v608_v35, %v593_v43 }
 0x1c7   : > { %v613_v49 = vmul.f32 %v604_v39, %v592_v46 }
 0x1c8   : > { %v1231_v50 = vpack.c.bf16 %v614_v48, %v614_v48  ;;  %v1351_v58 = vpack.c.bf16 %v612_v47, %v612_v47 }
 0x1c9   : > { %v1230_v51 = vpack.c.bf16 %v613_v49, %v612_v47  ;;  %v1352_v60 = vpack.c.bf16 %v613_v49, %v613_v49 }
 0x1ca   : > { %629 = vst [vmem:[#allocation2 + $0xc] sm:$0xf] %v1231_v50 }
 0x1cb   : > { %628 = vst [vmem:[#allocation2 + $0x4] sm:$0xff] %v1230_v51 }
 0x1d1   : > { %v1350_v59 = vld [vmem:[#allocation2 + $0xc] ss:$0 sps:$4 sm:$0xff]  }
 0x1d2   : > { %v631_v52 = vld [vmem:[#allocation2 + $0x8] sm:$0xff]  ;;  %v630_v53 = vld [vmem:[#allocation2] sm:$0xff] }
 0x1d3   : > { %v1212_v54 = vcombine.high %v631_v52, %v631_v52  ;;  %v1766_v55 = vcombine.high %v630_v53, %v630_v53  ;;  %v1771_v56 = vcombine.low %v631_v52, %v631_v52  ;;  %v1777_v57 = vcombine.low %v630_v53, %v630_v53 }
 0x1d5   : > { %650 = vrot.lane.b32.xlu0 %v1212_v54, %s1453_s24  ;;  %646 = vrot.lane.b32.xlu1 %v1766_v55, %s1453_s24 }
 0x1d9   : > { %657 = vrot.lane.b32.xlu0 %v1766_v55, %s1454_s16  ;;  %648 = vrot.lane.b32.xlu1 %v1771_v56, %s1453_s24 }
 0x1dd   : > { %661 = vrot.lane.b32.xlu0 %v1212_v54, %s1454_s16  ;;  %644 = vrot.lane.b32.xlu1 %v1777_v57, %s1453_s24 }
 0x1e1   : > { %670 = vrot.lane.b32.xlu0 %v1771_v56, %s1455_s26  ;;  %659 = vrot.lane.b32.xlu1 %v1771_v56, %s1454_s16 }
 0x1e5   : > { %655 = vrot.lane.b32.xlu0 %v1777_v57, %s1454_s16  ;;  %668 = vrot.lane.b32.xlu1 %v1766_v55, %s1455_s26 }
 0x1e9   : > { %679 = vrot.lane.b32.xlu0 %v1766_v55, %s1456_s10  ;;  %672 = vrot.lane.b32.xlu1 %v1212_v54, %s1455_s26 }
 0x1ed   : > { %683 = vrot.lane.b32.xlu0 %v1212_v54, %s1456_s10  ;;  %666 = vrot.lane.b32.xlu1 %v1777_v57, %s1455_s26  ;;  %s1953_s26 = scalar_lea.hbm %s2005_s8, %s1281_s23 }
 0x1f1   : > { %692 = vrot.lane.b32.xlu0 %v1771_v56, %s1457_s12  ;;  %681 = vrot.lane.b32.xlu1 %v1771_v56, %s1456_s10 }
 0x1f5   : > { %677 = vrot.lane.b32.xlu0 %v1777_v57, %s1456_s10  ;;  %690 = vrot.lane.b32.xlu1 %v1766_v55, %s1457_s12  ;;  %s1383_s10 = scalar_lea.vmem %s1955_s21, 384 }
 0x1f6   : > { %p1384_p6 = scmp.ne.s32.totalorder %s1955_s21, %s1383_s10 }
 0x1f8   : > { %p1385_p12 = pnand %p1384_p6, %p2014_p11 }
 0x1f9   : > { %701 = vrot.lane.b32.xlu0 %v1766_v55, %s1458_s19  ;;  %694 = vrot.lane.b32.xlu1 %v1212_v54, %s1457_s12 }
 0x1fa   : > { %p1386_p13 = pneg %p1385_p12 }
 0x1fd   : > { %705 = vrot.lane.b32.xlu0 %v1212_v54, %s1458_s19  ;;  %688 = vrot.lane.b32.xlu1 %v1777_v57, %s1457_s12 }
 0x201   : > { %714 = vrot.lane.b32.xlu0 %v1771_v56, %s1459_s25  ;;  %703 = vrot.lane.b32.xlu1 %v1771_v56, %s1458_s19 }
 0x205   : > { %699 = vrot.lane.b32.xlu0 %v1777_v57, %s1458_s19  ;;  %712 = vrot.lane.b32.xlu1 %v1766_v55, %s1459_s25 }
 0x209   : > { %729 = vrot.lane.b32.xlu0 %v1351_v58, %s1462_s15  ;;  %716 = vrot.lane.b32.xlu1 %v1212_v54, %s1459_s25 }
 0x20d   : > { %733 = vrot.lane.b32.xlu0 %v1350_v59, %s1462_s15  ;;  %710 = vrot.lane.b32.xlu1 %v1777_v57, %s1459_s25 }
 0x211   : > { %731 = vrot.lane.b32.xlu1 %v1352_v60, %s1462_s15 }
 0x247   : > { %v651_v61 = vpop.permute.xlu0 %650  ;;  %v647_v62 = vpop.permute.xlu1 %646 }
 0x248   : > { %v748_v63 = vsel %vm441_vm2, %v1212_v54, %v651_v61 }
 0x249   : > { %814 = vrot.lane.b32.xlu0 %v748_v63, %s1457_s12 }
 0x24b   : > { %v658_v1 = vpop.permute.xlu0 %657  ;;  %v649_v2 = vpop.permute.xlu1 %648 }
 0x24c   : > { %v653_v34 = vsel %vm353_vm1, %v647_v62, %v649_v2  ;;  %v654_v36 = vsel %vm353_vm1, %v649_v2, %v651_v61 }
 0x24d   : > { %v742_v37 = vsel %vm441_vm2, %v1766_v55, %v653_v34  ;;  %v745_v39 = vsel %vm441_vm2, %v1771_v56, %v654_v36 }
 0x24f   : > { %v662_v8 = vpop.permute.xlu0 %661  ;;  %v645_v9 = vpop.permute.xlu1 %644 }
 0x250   : > { %v652_v38 = vsel %vm353_vm1, %v645_v9, %v647_v62 }
 0x251   : > { %v739_v42 = vsel %vm441_vm2, %v1777_v57, %v652_v38 }
 0x253   : > { %v671_v10 = vpop.permute.xlu0 %670  ;;  %v660_v11 = vpop.permute.xlu1 %659 }
 0x254   : > { %v665_v41 = vsel %vm365_vm3, %v660_v11, %v662_v8  ;;  %v664_v46 = vsel %vm365_vm3, %v658_v1, %v660_v11 }
 0x257   : > { %v656_v12 = vpop.permute.xlu0 %655  ;;  %v669_v13 = vpop.permute.xlu1 %668 }
 0x258   : > { %v675_v43 = vsel %vm377_vm4, %v669_v13, %v671_v10  ;;  %v663_v53 = vsel %vm365_vm3, %v656_v12, %v658_v1 }
 0x259   : > { %v754_v49 = vsel %vm441_vm2, %v664_v46, %v675_v43 }
 0x25b   : > { %v1826_v14 = vpop.permute.xlu0 %679  ;;  %v673_v15 = vpop.permute.xlu1 %672 }
 0x25c   : > { %v760_v16 = vsel %vm441_vm2, %v662_v8, %v673_v15  ;;  %v676_v40 = vsel %vm377_vm4, %v671_v10, %v673_v15 }
 0x25d   : > { %822 = vrot.lane.b32.xlu0 %v760_v16, %s1457_s12  ;;  %v757_v44 = vsel %vm441_vm2, %v665_v41, %v676_v40 }
 0x25f   : > { %v684_v17 = vpop.permute.xlu0 %683  ;;  %v667_v18 = vpop.permute.xlu1 %666 }
 0x260   : > { %v674_v50 = vsel %vm377_vm4, %v667_v18, %v669_v13 }
 0x261   : > { %v751_v55 = vsel %vm441_vm2, %v663_v53, %v674_v50 }
 0x263   : > { %v693_v19 = vpop.permute.xlu0 %692  ;;  %v682_v20 = vpop.permute.xlu1 %681 }
 0x264   : > { %v687_v47 = vsel %vm389_vm5, %v682_v20, %v684_v17  ;;  %v686_v59 = vsel %vm389_vm5, %v1826_v14, %v682_v20 }
 0x267   : > { %v678_v21 = vpop.permute.xlu0 %677  ;;  %v691_v22 = vpop.permute.xlu1 %690 }
 0x268   : > { %v697_v56 = vsel %vm401_vm6, %v691_v22, %v693_v19  ;;  %v685_v63 = vsel %vm389_vm5, %v678_v21, %v1826_v14  ;;  %v974_v14 = vld [vmem:[%s2004_s7] sm:$0xff] }
 0x269   : > { %v766_v60 = vsel %vm441_vm2, %v686_v59, %v697_v56 }
 0x26b   : > { %v1830_v23 = vpop.permute.xlu0 %701  ;;  %v695_v24 = vpop.permute.xlu1 %694 }
 0x26c   : > { %v772_v25 = vsel %vm441_vm2, %v684_v17, %v695_v24  ;;  %v698_v45 = vsel %vm401_vm6, %v693_v19, %v695_v24 }
 0x26d   : > { %830 = vrot.lane.b32.xlu0 %v772_v25, %s1457_s12  ;;  %v769_v51 = vsel %vm441_vm2, %v687_v47, %v698_v45 }
 0x26f   : > { %v706_v26 = vpop.permute.xlu0 %705  ;;  %v689_v27 = vpop.permute.xlu1 %688 }
 0x270   : > { %v696_v61 = vsel %vm401_vm6, %v689_v27, %v691_v22 }
 0x271   : > { %v763_v1 = vsel %vm441_vm2, %v685_v63, %v696_v61 }
 0x273   : > { %v715_v28 = vpop.permute.xlu0 %714  ;;  %v704_v29 = vpop.permute.xlu1 %703 }
 0x274   : > { %v709_v54 = vsel %vm413_vm7, %v704_v29, %v706_v26  ;;  %v708_v9 = vsel %vm413_vm7, %v1830_v23, %v704_v29 }
 0x277   : > { %v700_v30 = vpop.permute.xlu0 %699  ;;  %v713_v31 = vpop.permute.xlu1 %712 }
 0x278   : > { %v719_v2 = vsel %vm425_vm8, %v713_v31, %v715_v28  ;;  %v707_v12 = vsel %vm413_vm7, %v700_v30, %v1830_v23 }
 0x279   : > { %v778_v10 = vsel %vm441_vm2, %v708_v9, %v719_v2 }
 0x27b   : > { %v730_v32 = vpop.permute.xlu0 %729  ;;  %v717_v33 = vpop.permute.xlu1 %716 }
 0x27c   : > { %840 = vrot.lane.b32.xlu1 %v730_v32, %s1457_s12  ;;  %v784_v35 = vsel %vm441_vm2, %v706_v26, %v717_v33  ;;  %v720_v52 = vsel %vm425_vm8, %v715_v28, %v717_v33 }
 0x27d   : > { %838 = vrot.lane.b32.xlu0 %v784_v35, %s1457_s12  ;;  %v781_v57 = vsel %vm441_vm2, %v709_v54, %v720_v52 }
 0x27f   : > { %v711_v48 = vpop.permute.xlu1 %710  ;;  %v734_v8 = vpop.permute.xlu0 %733 }
 0x280   : > { %810 = vrot.lane.b32.xlu1 %v742_v37, %s1457_s12  ;;  %v718_v11 = vsel %vm425_vm8, %v711_v48, %v713_v31 }
 0x281   : > { %812 = vrot.lane.b32.xlu0 %v745_v39, %s1457_s12  ;;  %v775_v13 = vsel %vm441_vm2, %v707_v12, %v718_v11 }
 0x283   : > { %v732_v58 = vpop.permute.xlu1 %731 }
 0x284   : > { %808 = vrot.lane.b32.xlu1 %v739_v42, %s1457_s12  ;;  %v735_v62 = vsel %vm437_vm9, %v730_v32, %v732_v58  ;;  %v736_v15 = vsel %vm437_vm9, %v732_v58, %v734_v8 }
 0x285   : > { %820 = vrot.lane.b32.xlu0 %v757_v44, %s1457_s12 }
 0x288   : > { %818 = vrot.lane.b32.xlu1 %v754_v49, %s1457_s12 }
 0x289   : > { %828 = vrot.lane.b32.xlu0 %v769_v51, %s1457_s12  ;;  %v785_v51 = vld [vmem:[%s2001_s4] sm:$0xf] }
 0x28c   : > { %816 = vrot.lane.b32.xlu1 %v751_v55, %s1457_s12 }
 0x28d   : > { %836 = vrot.lane.b32.xlu0 %v781_v57, %s1457_s12 }
 0x290   : > { %826 = vrot.lane.b32.xlu1 %v766_v60, %s1457_s12 }
 0x291   : > { %842 = vrot.lane.b32.xlu0 %v735_v62, %s1457_s12 }
 0x294   : > { %824 = vrot.lane.b32.xlu1 %v763_v1, %s1457_s12 }
 0x295   : > { %846 = vrot.lane.b32.xlu0 %v734_v8, %s1457_s12 }
 0x298   : > { %834 = vrot.lane.b32.xlu1 %v778_v10, %s1457_s12 }
 0x299   : > { %992 = vrot.lane.b32.xlu0 %v1627_v3, %s1462_s15  ;;  %v786_v3 = vld [vmem:[%s2002_s5] sm:$0xff] }
 0x29c   : > { %832 = vrot.lane.b32.xlu1 %v775_v13, %s1457_s12 }
 0x29d   : > { %996 = vrot.lane.b32.xlu0 %v1637_v6, %s1462_s15 }
 0x2a0   : > { %844 = vrot.lane.b32.xlu1 %v736_v15, %s1457_s12  ;;  %s1463_s12 = smov [#allocation6]  }
 0x2a1   : > { %977 = vperm.xlu0 %1339, %v974_v14   ;;  %s1387_s19 = sshll.u32 %s1463_s12, 4  ;;  %s1388_s19 = int_to_ptr.vmem [resolvable:$false] %s1387_s19 }
 0x2a2   : > { %s1389_s25 = scalar_lea.vmem %s1388_s19, 768  ;;  %p1390_p7 = scmp.lt.s32.totalorder %s1955_s21, %s1388_s19 }
 0x2a3   : > { %p1391_p10 = scmp.lt.s32.totalorder %s1389_s25, %s1383_s10 }
 0x2a4   : > { %990 = vrot.lane.b32.xlu1 %v1629_v4, %s1462_s15 }
 0x2a5   : > { %p1392_p2 = por %p1391_p10, %p1390_p7 }
 0x2a7   : > { %p1393_p4 = pnand %p1392_p2, %p1386_p13 }
 0x2a8   : > { %994 = vrot.lane.b32.xlu1 %v1635_v5, %s1462_s15 }
 0x2ac   : > { %789 = vperm.xlu1 %1340, %v786_v3  }
 0x2bb   : > { %v815_v6 = vpop.permute.xlu0 %814 }
 0x2cf   : > { %v823_v16 = vpop.permute.xlu0 %822 }
 0x2df   : > { %v831_v17 = vpop.permute.xlu0 %830 }
 0x2ee   : > { %v841_v18 = vpop.permute.xlu1 %840 }
 0x2ef   : > { %v839_v19 = vpop.permute.xlu0 %838 }
 0x2f2   : > { %v811_v20 = vpop.permute.xlu1 %810 }
 0x2f3   : > { %v813_v21 = vpop.permute.xlu0 %812 }
 0x2f4   : > { %v850_v22 = vsel %vm401_vm6, %v813_v21, %v815_v6  ;;  %v849_v23 = vsel %vm401_vm6, %v811_v20, %v813_v21 }
 0x2f5   : > { %887 = vmatprep.subr.bf16.mxu0 %v849_v23  ;;  %1261 = vmatpush3.bf16.msra.mxu1 %v850_v22 }
 0x2f6   : > { %v809_v4 = vpop.permute.xlu1 %808  ;;  %1262 = vmatprep.subr.bf16.mxu1 %v1452_v0 }
 0x2f7   : > { %v848_v5 = vsel %vm401_vm6, %v809_v4, %v811_v20  ;;  %v821_v24 = vpop.permute.xlu0 %820 }
 0x2f8   : > { %v853_v25 = vsel %vm401_vm6, %v821_v24, %v823_v16  ;;  %888 = vmatpush1.bf16.msra.mxu0 %v848_v5 }
 0x2f9   : > { %1263 = vmatpush3.bf16.msra.mxu1 %v853_v25 }
 0x2fa   : > { %v819_v26 = vpop.permute.xlu1 %818  ;;  %1264 = vmatprep.subr.bf16.mxu1 %v1452_v0 }
 0x2fb   : > { %v829_v27 = vpop.permute.xlu0 %828  ;;  %v852_v28 = vsel %vm401_vm6, %v819_v26, %v821_v24 }
 0x2fc   : > { %v856_v29 = vsel %vm401_vm6, %v829_v27, %v831_v17  ;;  %889 = vmatprep.subr.bf16.mxu0 %v852_v28 }
 0x2fd   : > { %1265 = vmatpush3.bf16.msra.mxu1 %v856_v29 }
 0x2fe   : > { %v817_v30 = vpop.permute.xlu1 %816  ;;  %1266 = vmatprep.subr.bf16.mxu1 %v1452_v0 }
 0x2ff   : > { %v851_v31 = vsel %vm401_vm6, %v817_v30, %v819_v26  ;;  %v837_v32 = vpop.permute.xlu0 %836 }
 0x300   : > { %v859_v33 = vsel %vm401_vm6, %v837_v32, %v839_v19  ;;  %890 = vmatpush1.bf16.msra.mxu0 %v851_v31 }
 0x301   : > { %1267 = vmatpush3.bf16.msra.mxu1 %v859_v33 }
 0x302   : > { %v827_v34 = vpop.permute.xlu1 %826  ;;  %1268 = vmatprep.subr.bf16.mxu1 %v1452_v0 }
 0x303   : > { %v855_v35 = vsel %vm401_vm6, %v827_v34, %v829_v27  ;;  %v843_v38 = vpop.permute.xlu0 %842 }
 0x304   : > { %891 = vmatprep.subr.bf16.mxu0 %v855_v35  ;;  %v860_v44 = vsel %vm401_vm6, %v841_v18, %v843_v38 }
 0x305   : > { %v879_v49 = vsel %vm441_vm2, %v860_v44, 0 }
 0x306   : > { %v825_v36 = vpop.permute.xlu1 %824 }
 0x307   : > { %v854_v37 = vsel %vm401_vm6, %v825_v36, %v827_v34  ;;  %v847_v41 = vpop.permute.xlu0 %846 }
 0x308   : > { %892 = vmatpush1.bf16.msra.mxu0 %v854_v37 }
 0x30a   : > { %v835_v39 = vpop.permute.xlu1 %834 }
 0x30b   : > { %v858_v40 = vsel %vm401_vm6, %v835_v39, %v837_v32  ;;  %v993_v46 = vpop.permute.xlu0 %992 }
 0x30c   : > { %893 = vmatprep.subr.bf16.mxu0 %v858_v40 }
 0x30e   : > { %v833_v42 = vpop.permute.xlu1 %832 }
 0x30f   : > { %v857_v43 = vsel %vm401_vm6, %v833_v42, %v835_v39  ;;  %v997_v53 = vpop.permute.xlu0 %996 }
 0x310   : > { %894 = vmatpush1.bf16.msra.mxu0 %v857_v43 }
 0x312   : > { %v845_v45 = vpop.permute.xlu1 %844 }
 0x313   : > { %v861_v47 = vsel %vm401_vm6, %v843_v38, %v845_v45  ;;  %v862_v48 = vsel %vm401_vm6, %v845_v45, %v847_v41 }
 0x314   : > { %v885_v50 = vsel %vm441_vm2, %v862_v48, 0  ;;  %1216 = vmatprep.subr.msk.bf16.mxu0 %vm441_vm2, %v861_v47 }
 0x315   : > { %896 = vmatpush1.bf16.msra.mxu0 %v879_v49  ;;  %1269 = vmatpush3.bf16.msra.mxu1 %v885_v50 }
 0x316   : > { %v991_v52 = vpop.permute.xlu1 %990  ;;  %1274 = vmatprep.subr.bf16.mxu1 %v1452_v0 }
 0x317   : > { %v998_v54 = vsel %vm437_vm9, %v991_v52, %v993_v46 }
 0x318   : > { %1217 = vmatmul.mubr.msk.bf16.vlgmr.msra.gmra.mrb[4].mxu0 %vm497_vm10, %v785_v51  ;;  %1271 = vmatmul.mubr.msk.bf16.vlgmr.msra.gmra.mrb[4].mxu1 %vm497_vm10, %v785_v51  ;;  %v1006_v58 = vsel %vm441_vm2, %v998_v54, 0 }
 0x319   : > { %1046 = vmatprep.mubr.bf16.mxu0 %v1460_v7  ;;  %1276 = vmatprep.mubr.msk.bf16.mxu1 %vm1461_vm0, %v1452_v0  ;;  %v973_v7 = vld [vmem:[%s2003_s6] sm:$0xf] }
 0x31a   : > { %v995_v55 = vpop.permute.xlu1 %994 }
 0x31b   : > { %v999_v56 = vsel %vm437_vm9, %v993_v46, %v995_v55  ;;  %v1000_v57 = vsel %vm437_vm9, %v995_v55, %v997_v53 }
 0x31c   : > { %v1012_v59 = vsel %vm441_vm2, %v1000_v57, 0  ;;  %1223 = vmatprep.subr.msk.bf16.mxu0 %vm441_vm2, %v999_v56 }
 0x31d   : > { %1015 = vmatpush1.bf16.msra.mxu0 %v1006_v58  ;;  %1275 = vmatpush3.bf16.msra.mxu1 %v1012_v59 }
 0x320   : > { %1224 = vmatmul.mubr.msk.bf16.vlgmr.msra.gmra.mrb[8].mxu0 %vm1001_vm11, %v973_v7  ;;  %1277 = vmatmul.mubr.msk.bf16.vlgmr.msra.gmra.mrb[8].mxu1 %vm1001_vm11, %v973_v7  ;;  %v978_v13 = vpop.permute.xlu0 %977 }
 0x32b   : > { %v790_v0 = vpop.permute.xlu1 %789 }
 0x3eb   : > { %v921_v60 = vpop.f32.mrb[4].mxu0  ;;  %v962_v61 = vpop.f32.mrb[4].mxu1 }
 0x3ec   : > { %v923_v62 = vpop.f32.mrb[5].mxu0  ;;  %v1272_v63 = vpop.f32.mrb[5].mxu1  ;;  %v922_v10 = vadd.f32 %v921_v60, %v790_v0  ;;  %v963_v11 = vadd.f32 %v962_v61, %v790_v0 }
 0x3ed   : > { %v925_v1 = vpop.f32.mrb[6].mxu0  ;;  %v965_v2 = vpop.f32.mrb[6].mxu1  ;;  %v924_v12 = vadd.f32 %v923_v62, %v790_v0 }
 0x3ee   : > { %v926_v8 = vpop.f32.mrb[7].mxu0  ;;  %v1273_v9 = vpop.f32.mrb[7].mxu1  ;;  %v968_v3 = vmax.f32 %v922_v10, 0.0  ;;  %v970_v6 = vmax.f32 %v963_v11, 0.0 }
 0x3ef   : > { %v969_v20 = vmax.f32 %v924_v12, 0.0 }
 0x3f3   : > { %v1048_v14 = vpop.f32.mrb[8].mxu0  ;;  %v1089_v15 = vpop.f32.mrb[8].mxu1 }
 0x3f4   : > { %v1049_v16 = vadd.f32 %v1048_v14, %v978_v13  ;;  %v1090_v17 = vadd.f32 %v1089_v15, %v978_v13  ;;  %v1050_v18 = vpop.f32.mrb[9].mxu0  ;;  %v1278_v19 = vpop.f32.mrb[9].mxu1 }
 0x3f5   : > { %v1051_v21 = vadd.f32 %v1050_v18, %v978_v13  ;;  %v1052_v22 = vpop.f32.mrb[10].mxu0  ;;  %v1092_v23 = vpop.f32.mrb[10].mxu1 }
 0x3f6   : > { %v1095_v4 = vadd.f32 %v1049_v16, %v968_v3  ;;  %v1097_v5 = vadd.f32 %v1090_v17, %v970_v6  ;;  %v1053_v24 = vpop.f32.mrb[11].mxu0  ;;  %v1279_v25 = vpop.f32.mrb[11].mxu1 }
 0x3f7   : > { %v1096_v26 = vadd.f32 %v1051_v21, %v969_v20 }
 0x3f8   : > { %v1098_v27 = vmax.f32 %v1095_v4, 0.0  ;;  %v1100_v28 = vmax.f32 %v1097_v5, 0.0 }
 0x3f9   : > { %v1099_v29 = vmax.f32 %v1096_v26, 0.0 }
 0x3fa   : > { %1101 = vst [vmem:[%s321_s20] sm:$0xff] %v1098_v27  ;;  %1103 = vst [vmem:[%s321_s20 + $0x10] sm:$0xff] %v1100_v28 }
 0x3fb   : > { %1102 = vst [vmem:[%s321_s20 + $0x8] sm:$0xff] %v1099_v29 }
 0x3fc   : > { %1396 = shalt.err (!%p1393_p4)
}
 0x3fd   : > { %s1397_s13 = scalar_lea.hbm %s1953_s26, 384  ;;  %s1401_s23 = scalar_lea.hbm %s2005_s8, 768 }
 0x3fe   : > { %p1398_p5 = scmp.ne.s32.totalorder %s1953_s26, %s1397_s13  ;;  %p1402_p0 = scmp.lt.u32.totalorder %s1953_s26, %s2005_s8 }
 0x3ff   : > { %p1403_p1 = scmp.lt.u32.totalorder %s1401_s23, %s1397_s13  ;;  %p1405_p6 = scmp.lt.u32.totalorder %s1397_s13, %s1953_s26 }
 0x400   : > { %p1399_p8 = pnand %p1398_p5, %p2014_p11 }
 0x401   : > { %p1404_p3 = por %p1403_p1, %p1402_p0 }
 0x402   : > { %p1400_p9 = pneg %p1399_p8 }
 0x403   : > { %p1406_p12 = por %p1405_p6, %p1404_p3 }
 0x405   : > { %p1407_p13 = pnand %p1406_p12, %p1400_p9 }
 0x407   : > { %1410 = shalt.err (!%p1407_p13)
}
 0x408   : > { %1284 = dma.vmem_to_hbm [thread:$0]  (%p2014_p11), %s1955_s21, 384, %s1953_s26, %s1105_s9  }
 0x409 PF: > { %s1131_s16 = sand.u32 1, %s1437_s27   ;;  %p2015_p7 = scmp.ne.s32.totalorder %s2010_s18, 0 }
 0x40a   : > { %p2016_p10 = scmp.ge.s32.totalorder %s1449_s30, 2  ;;  %s1132_s10 = scalar_lea.sflag [#allocation5], %s1131_s16 }
 0x40c   : > { %p1291_p2 = pnand %p2016_p10, %p2015_p7 }
 0x40e   : > { %1432 = dma.done.wait (!%p1291_p2), %s1132_s10, 384  }
 0x40f   : > { %1434 = vsyncadd (!%p1291_p2), %s1132_s10, 4294966912  ;;  %p21_p4 = scmp.ge.s32.totalorder %s1534_s11, 4   ;;  %s2017_s27 = smov %s1441_s28 }
 0x410   : > { %s2018_s28 = smov %s1445_s29  ;;  %s2019_s29 = smov %s1546_s14 }
 0x411   : > { %s2020_s30 = smov %s1534_s11  ;;  %23 = sbr.rel (!%p21_p4) target bundleno = 5 (0x5), region = 97 }
 0x418   :  { %1137 = vsyncpa [#allocation4], 1 }
 0x419   :  { %1139 = vsyncpa [#allocation4 + $0x1], 1 }
 0x41a   :  { %1140 = vsyncpa [#allocation5], 1 }
 0x41b   :  { %1142 = vsyncpa [#allocation5 + $0x1], 1 }

</bundles_post_ra>
